<compile_context>
chip_gen: v6e
topology: v6e:2x2x1
jax: 0.10.0
libtpu: 0.0.40
codegen_flags: <defaults>
</compile_context>

<pallas_src>
import jax
import jax.numpy as jnp
from jax.experimental import pallas as pl
from jax.experimental.pallas import tpu as pltpu


def _anchor2vec_kernel(x_ref, vec_ref):
    """One (row-group, lane-tile) block.

    x_ref:   (G, R, T)  anchor logits in their native dtype
    vec_ref: (G, T)     f32 softmax expectation over R
    """
    x = x_ref[...].astype(jnp.float32)                       # (G, R, T)
    m = jnp.max(x, axis=1, keepdims=True)                    # (G, 1, T)
    e = jnp.exp(x - m)                                       # (G, R, T)
    # Conv3d weight == arange(R), generated in-kernel (VPU iota, no DMA).
    w = jax.lax.broadcasted_iota(jnp.int32, e.shape, 1).astype(jnp.float32)
    num = jnp.sum(e * w, axis=1)                             # (G, T)
    den = jnp.sum(e, axis=1)                                 # (G, T)
    # Fused normalization: one approx EUP reciprocal + one multiply per lane
    # instead of R per-lane divides over a full (G, R, T) temporary.
    vec_ref[...] = (num * pl.reciprocal(den, approx=True)).astype(vec_ref.dtype)


def _choose_lane_tile(hw: int, max_tile: int = 2048) -> int:
    """Largest multiple-of-128 divisor of hw that is <= max_tile (else full hw)."""
    if hw <= max_tile or hw % 128 != 0:
        return hw  # full-extent block is always legal (masked tails if ragged)
    tile = max_tile - (max_tile % 128)
    while hw % tile != 0:
        tile -= 128
    return tile


def _choose_row_group(bp: int, max_rows: int = 32) -> int:
    """(b,p)-rows per block: multiple of 8 dividing bp for sublane-dense stores."""
    if bp % 8 != 0:
        return bp  # block equals the full dim -> legal
    g = min(max_rows, bp)
    g -= g % 8
    while bp % g != 0:
        g -= 8
    return g


def anchor2vec(anchor_x: jax.Array, reg_max: int = 16):
    """Pallas implementation of Anchor2Vec.forward.

    Args:
        anchor_x: [B, 4*reg_max, H, W] array (NCHW, like the PyTorch module).

    Returns:
        (anchor_out, vector_out):
            anchor_out: [B, reg_max, 4, H, W]  (rearranged input, pre-softmax)
            vector_out: [B, 4, H, W]           (softmax expectation over reg_max)
    """
    B, C, H, W = anchor_x.shape
    R = reg_max
    P = C // R
    assert P * R == C, "channel dim must be 4 * reg_max"
    HW = H * W
    BP = B * P

    # channel = (P outer, R inner) -> rows of (b, p): [B*P, R, HW].
    # NOTE: no .astype here -- the kernel casts on load (saves a full-size
    # HBM copy + halves kernel read bytes when the input is bf16).
    x2d = anchor_x.reshape(BP, R, HW)

    g_rows = _choose_row_group(BP)
    lane_tile = _choose_lane_tile(HW)
    grid = (BP // g_rows, HW // lane_tile)

    vec = pl.pallas_call(
        _anchor2vec_kernel,
        out_shape=jax.ShapeDtypeStruct((BP, HW), jnp.float32),
        grid=grid,
        in_specs=[
            pl.BlockSpec((g_rows, R, lane_tile), lambda g, t: (g, 0, t)),
        ],
        out_specs=pl.BlockSpec((g_rows, lane_tile), lambda g, t: (g, t)),
        compiler_params=pltpu.CompilerParams(
            dimension_semantics=("parallel", "parallel"),
        ),
    )(x2d)

    # First returned tensor: rearranged (not softmaxed) anchors, [B, R, P, H, W].
    # Pure data movement; kept in XLA (see header comment).
    anchor_out = jnp.transpose(anchor_x.reshape(B, P, R, H, W), (0, 2, 1, 3, 4))
    vector_out = vec.reshape(B, P, H, W)
    return anchor_out, vector_out


def _reference(anchor_x: jax.Array, reg_max: int = 16):
    """Pure-JAX reference mirroring the PyTorch module."""
    B, C, H, W = anchor_x.shape
    R = reg_max
    P = C // R
    a = jnp.transpose(anchor_x.reshape(B, P, R, H, W), (0, 2, 1, 3, 4))  # [B,R,P,H,W]
    sm = jax.nn.softmax(a.astype(jnp.float32), axis=1)
    w = jnp.arange(R, dtype=jnp.float32).reshape(1, R, 1, 1, 1)
    vec = jnp.sum(sm * w, axis=1)  # [B, P, H, W]
    return a, vec


if __name__ == "__main__":
    key = jax.random.PRNGKey(0)
    B, reg_max, H, W = 2, 16, 16, 16
    x = jax.random.normal(key, (B, 4 * reg_max, H, W), dtype=jnp.float32)

    anchor_out, vector_out = anchor2vec(x, reg_max=reg_max)
    anchor_out = jax.block_until_ready(anchor_out)
    vector_out = jax.block_until_ready(vector_out)

    ref_anchor, ref_vec = _reference(x, reg_max=reg_max)

    assert anchor_out.shape == (B, reg_max, 4, H, W)
    assert vector_out.shape == (B, 4, H, W)
    assert jnp.allclose(anchor_out, ref_anchor)
    # Tolerance covers the approximate EUP reciprocal used for the softmax
    # denominator (values lie in [0, reg_max)).
    assert jnp.allclose(vector_out, ref_vec, atol=2e-3, rtol=2e-3)

    print("KERNEL_OK")
</pallas_src>

<mosaic_0001>
module attributes {stable_mosaic.version = 11 : i64} {
  func.func @_anchor2vec_kernel(%arg0: i32, %arg1: i32, %arg2: memref<8x16x256xf32, #tpu.memory_space<vmem>>, %arg3: memref<8x256xf32, #tpu.memory_space<vmem>>) attributes {dimension_semantics = [#tpu.dimension_semantics<parallel>, #tpu.dimension_semantics<parallel>], iteration_bounds = array<i64: 1, 1>, scalar_prefetch = 0 : i64, scratch_operands = 0 : i64, tpu.core_type = #tpu.core_type<tc>, window_params = [{transform_indices = @transform_0, window_bounds = array<i64: 8, 16, 256>}, {transform_indices = @transform_1, window_bounds = array<i64: 8, 256>}]} {
    %c0 = arith.constant 0 : index
    %c0_0 = arith.constant 0 : index
    %c0_1 = arith.constant 0 : index
    %0 = vector.load %arg2[%c0, %c0_0, %c0_1] : memref<8x16x256xf32, #tpu.memory_space<vmem>>, vector<8x16x256xf32>
    %cst = arith.constant dense<0xFF800000> : vector<8x256xf32>
    %1 = vector.multi_reduction <maximumf>, %0, %cst [1] : vector<8x16x256xf32> to vector<8x256xf32>
    %2 = vector.shape_cast %1 : vector<8x256xf32> to vector<8x1x256xf32>
    %3 = vector.broadcast %2 : vector<8x1x256xf32> to vector<8x16x256xf32>
    %4 = arith.subf %0, %3 : vector<8x16x256xf32>
    %5 = math.exp %4 : vector<8x16x256xf32>
    %6 = tpu.iota {dimensions = array<i32: 1>} : vector<8x16x256xi32>
    %7 = arith.sitofp %6 : vector<8x16x256xi32> to vector<8x16x256xf32>
    %8 = arith.mulf %5, %7 : vector<8x16x256xf32>
    %cst_2 = arith.constant dense<0.000000e+00> : vector<8x256xf32>
    %9 = vector.multi_reduction <add>, %8, %cst_2 [1] : vector<8x16x256xf32> to vector<8x256xf32>
    %cst_3 = arith.constant dense<0.000000e+00> : vector<8x256xf32>
    %10 = vector.multi_reduction <add>, %5, %cst_3 [1] : vector<8x16x256xf32> to vector<8x256xf32>
    %11 = tpu.reciprocal %10 {approx = true} : vector<8x256xf32> -> vector<8x256xf32>
    %12 = arith.mulf %9, %11 : vector<8x256xf32>
    %c0_4 = arith.constant 0 : index
    %c0_5 = arith.constant 0 : index
    %13 = vector.load %arg3[%c0_4, %c0_5] : memref<8x256xf32, #tpu.memory_space<vmem>>, vector<8x256xf32>
    tpu.vector_store %arg3[%c0_4, %c0_5], %12 {strides = array<i32>} : memref<8x256xf32, #tpu.memory_space<vmem>>, vector<8x256xf32>,
    return
  }
  func.func @transform_0(%arg0: i32, %arg1: i32) -> (i32, i32, i32) {
    %c0_i32 = arith.constant 0 : i32
    %c0_i32_0 = arith.constant 0 : i32
    return %arg0, %c0_i32, %arg1 : i32, i32, i32
  }
  func.func @transform_1(%arg0: i32, %arg1: i32) -> (i32, i32) {
    %c0_i32 = arith.constant 0 : i32
    return %arg0, %arg1 : i32, i32
  }
}

</mosaic_0001>

<bundles_post_ra>
// kernel: tpu_custom_call.1
= control target key start
LH: loop header
LB: loop body
LE: loop exit
PB: predicated region body
PF: predicated region fallthrough
CT: control target
= control target key end

     0   :  { %6 = vsyncpa [#allocation3], 0  ;;  %s1197_s0 = inlined_call_operand.hbm [shape: f32[8,16,256], index: 0, kind: input, shape index: {}]   ;;  %s1198_s1 = inlined_call_operand.hbm [shape: f32[8,256], index: 1, kind: output, shape index: {}]  }
   0x1   :  { %7 = vsyncpa [#allocation4], 0  ;;  %s756_s6 = smov [#allocation2]  }
   0x2   :  { %s13_s7 = sshll.u32 %s756_s6, 4  ;;  %s14_s7 = int_to_ptr.vmem [resolvable:$true] %s13_s7 }
   0x3   :  { %s720_s8 = scalar_lea.vmem %s14_s7, 4096  ;;  %p725_p1 = scmp.lt.s32.totalorder %s14_s7, %s14_s7 }
   0x4   :  { %p721_p0 = scmp.ne.s32.totalorder %s14_s7, %s720_s8  ;;  %p726_p2 = scmp.lt.s32.totalorder %s720_s8, %s720_s8 }
   0x6   :  { %p727_p3 = por %p726_p2, %p725_p1 }
   0x8   :  { %p728_p4 = pnand %p727_p3, %p721_p0 }
   0xa   :  { %731 = shalt.err (!%p728_p4)
}
   0xb   :  { %s757_s9 = smov 256   ;;  %s758_s10 = smov 16  }
   0xc   :  { %19 = dma.hbm_to_vmem [thread:$0]  %s1197_s0, 4096, %s14_s7, [#allocation3], %s757_s9, %s757_s9, %s758_s10  }
   0xd   :  { %752 = dma.done.wait [#allocation3], 4096  }
   0xe   :  { %753 = vsyncadd [#allocation3], 4294963200  ;;  %v773_v0 = vld [vmem:[#allocation2] sm:$0xff]  ;;  %v775_v1 = vld [vmem:[#allocation2 + $0x8] sm:$0xff]  ;;  %v263_v52 = vlaneseq  ;;  %vm572_vm0 = vcmask 1041409   ;;  %vm574_vm1 = vcmask 1042434  }
   0xf   :  { %v777_v2 = vld [vmem:[#allocation2 + $0x10] sm:$0xff]  ;;  %v779_v3 = vld [vmem:[#allocation2 + $0x18] sm:$0xff]  ;;  %v781_v4 = vld [vmem:[#allocation2 + $0x20] sm:$0xff]  ;;  %vm576_vm2 = vcmask 1043459   ;;  %vm578_vm3 = vcmask 1044484   ;;  %vm580_vm4 = vcmask 1045509  }
  0x10   :  { %v783_v5 = vld [vmem:[#allocation2 + $0x30] sm:$0xff]  ;;  %v785_v6 = vld [vmem:[#allocation2 + $0x28] sm:$0xff]  ;;  %v787_v7 = vld [vmem:[#allocation2 + $0x38] sm:$0xff]  ;;  %v55_v10 = vmax.f32 %v773_v0, %v777_v2  ;;  %v62_v11 = vmax.f32 %v775_v1, %v779_v3  ;;  %vm582_vm5 = vcmask 1046534   ;;  %vm584_vm6 = vcmask 1047559   ;;  %s759_s0 = smov [#allocation5]  }
  0x11   :  { %v789_v8 = vld [vmem:[#allocation2 + $0x40] sm:$0xff]  ;;  %v791_v9 = vld [vmem:[#allocation2 + $0x50] sm:$0xff]  ;;  %v797_v12 = vld [vmem:[#allocation2 + $0x48] sm:$0xff]  ;;  %v69_v14 = vmax.f32 %v781_v4, %v783_v5  ;;  %v76_v17 = vmax.f32 %v785_v6, %v787_v7  ;;  %s603_s13 = sshll.u32 %s759_s0, 4  ;;  %s604_s13 = int_to_ptr.vmem [resolvable:$true] %s603_s13 }
  0x12   :  { %v799_v13 = vld [vmem:[#allocation2 + $0x58] sm:$0xff]  ;;  %v803_v15 = vld [vmem:[#allocation2 + $0x60] sm:$0xff]  ;;  %v805_v16 = vld [vmem:[#allocation2 + $0x70] sm:$0xff]  ;;  %v83_v20 = vmax.f32 %v789_v8, %v791_v9  ;;  %v56_v21 = vrot.slane %v55_v10, 4  ;;  %v63_v22 = vrot.slane %v62_v11, 4  ;;  %s732_s14 = scalar_lea.vmem %s604_s13, 256  ;;  %p737_p6 = scmp.lt.s32.totalorder %s604_s13, %s604_s13 }
  0x13   :  { %v809_v18 = vld [vmem:[#allocation2 + $0x68] sm:$0xff]  ;;  %v811_v19 = vld [vmem:[#allocation2 + $0x78] sm:$0xff]  ;;  %v90_v23 = vmax.f32 %v797_v12, %v799_v13  ;;  %v70_v24 = vrot.slane %v69_v14, 4  ;;  %v97_v25 = vmax.f32 %v803_v15, %v805_v16  ;;  %v77_v26 = vrot.slane %v76_v17, 4  ;;  %v821_v42 = vld [vmem:[#allocation2 + $0x80] sm:$0xff]  ;;  %p733_p5 = scmp.ne.s32.totalorder %s604_s13, %s732_s14  ;;  %p738_p7 = scmp.lt.s32.totalorder %s732_s14, %s732_s14 }
  0x14   :  { %v104_v27 = vmax.f32 %v809_v18, %v811_v19  ;;  %v84_v28 = vrot.slane %v83_v20, 4  ;;  %v57_v29 = vmax.f32 %v55_v10, %v56_v21  ;;  %v64_v30 = vmax.f32 %v62_v11, %v63_v22  ;;  %v823_v43 = vld [vmem:[#allocation2 + $0x90] sm:$0xff]  ;;  %v825_v47 = vld [vmem:[#allocation2 + $0x88] sm:$0xff]  ;;  %v827_v48 = vld [vmem:[#allocation2 + $0x98] sm:$0xff] }
  0x15   :  { %v91_v31 = vrot.slane %v90_v23, 4  ;;  %v71_v32 = vmax.f32 %v69_v14, %v70_v24  ;;  %v98_v33 = vrot.slane %v97_v25, 4  ;;  %v78_v34 = vmax.f32 %v76_v17, %v77_v26  ;;  %v831_v56 = vld [vmem:[#allocation2 + $0xa0] sm:$0xff]  ;;  %v833_v57 = vld [vmem:[#allocation2 + $0xb0] sm:$0xff]  ;;  %v835_v60 = vld [vmem:[#allocation2 + $0xa8] sm:$0xff]  ;;  %p739_p8 = por %p738_p7, %p737_p6 }
  0x16   :  { %v105_v35 = vrot.slane %v104_v27, 4  ;;  %v85_v36 = vmax.f32 %v83_v20, %v84_v28  ;;  %v58_v37 = vrot.slane %v57_v29, 2  ;;  %v65_v38 = vrot.slane %v64_v30, 2  ;;  %v837_v61 = vld [vmem:[#allocation2 + $0xb8] sm:$0xff]  ;;  %v839_v62 = vld [vmem:[#allocation2 + $0xc0] sm:$0xff]  ;;  %v843_v11 = vld [vmem:[#allocation2 + $0xc8] sm:$0xff] }
  0x17   :  { %v92_v39 = vmax.f32 %v90_v23, %v91_v31  ;;  %v72_v40 = vrot.slane %v71_v32, 2  ;;  %v99_v41 = vmax.f32 %v97_v25, %v98_v33  ;;  %v79_v44 = vrot.slane %v78_v34, 2  ;;  %1206 = vst [vmem:[#allocation8_spill] sm:$0xff] %v839_v62  ;;  %1207 = vst [vmem:[#allocation9_spill] sm:$0xff] %v843_v11  ;;  %v845_v14 = vld [vmem:[#allocation2 + $0xd0] sm:$0xff]  ;;  %v847_v17 = vld [vmem:[#allocation2 + $0xd8] sm:$0xff]  ;;  %p740_p9 = pnand %p739_p8, %p733_p5 }
  0x18   :  { %v106_v45 = vmax.f32 %v104_v27, %v105_v35  ;;  %v86_v46 = vrot.slane %v85_v36, 2  ;;  %v59_v49 = vmax.f32 %v57_v29, %v58_v37  ;;  %v66_v50 = vmax.f32 %v64_v30, %v65_v38  ;;  %1208 = vst [vmem:[#allocation10_spill] sm:$0xff] %v845_v14  ;;  %1209 = vst [vmem:[#allocation11_spill] sm:$0xff] %v847_v17  ;;  %v855_v31 = vld [vmem:[#allocation2 + $0xe0] sm:$0xff] }
  0x19   :  { %v93_v51 = vrot.slane %v92_v39, 2  ;;  %v73_v53 = vmax.f32 %v71_v32, %v72_v40  ;;  %v100_v54 = vrot.slane %v99_v41, 2  ;;  %v111_v55 = vmax.f32 %v821_v42, %v823_v43  ;;  %v857_v32 = vld [vmem:[#allocation2 + $0xf0] sm:$0xff] }
  0x1a   :  { %v80_v58 = vmax.f32 %v78_v34, %v79_v44  ;;  %v107_v59 = vrot.slane %v106_v45, 2  ;;  %v87_v63 = vmax.f32 %v85_v36, %v86_v46  ;;  %v118_v10 = vmax.f32 %v825_v47, %v827_v48  ;;  %1210 = vst [vmem:[#allocation12_spill] sm:$0xff] %v857_v32  ;;  %v868_v44 = vld [vmem:[#allocation2 + $0xf8] sm:$0xff] }
  0x1b   :  { %v60_v20 = vrot.slane %v59_v49, 1  ;;  %v67_v21 = vrot.slane %v66_v50, 1  ;;  %v94_v22 = vmax.f32 %v92_v39, %v93_v51  ;;  %v849_v23 = vshrl.u32 %v263_v52, 7  ;;  %1212 = vst [vmem:[#allocation14_spill] sm:$0xff] %v868_v44 }
  0x1c   :  { %v74_v24 = vrot.slane %v73_v53, 1  ;;  %v101_v25 = vmax.f32 %v99_v41, %v100_v54  ;;  %v112_v26 = vrot.slane %v111_v55, 4  ;;  %v125_v27 = vmax.f32 %v831_v56, %v833_v57  ;;  %v866_v41 = vld [vmem:[#allocation2 + $0xe8] sm:$0xff] }
  0x1d   :  { %v81_v28 = vrot.slane %v80_v58, 1  ;;  %v108_v29 = vmax.f32 %v106_v45, %v107_v59  ;;  %v132_v30 = vmax.f32 %v835_v60, %v837_v61  ;;  %v88_v33 = vrot.slane %v87_v63, 1  ;;  %1211 = vst [vmem:[#allocation13_spill] sm:$0xff] %v866_v41 }
  0x1e   :  { %v119_v34 = vrot.slane %v118_v10, 4  ;;  %v139_v35 = vmax.f32 %v839_v62, %v845_v14  ;;  %v146_v36 = vmax.f32 %v843_v11, %v847_v17  ;;  %v61_v37 = vmax.f32 %v59_v49, %v60_v20 }
  0x1f   :  { %v68_v38 = vmax.f32 %v66_v50, %v67_v21  ;;  %v95_v39 = vrot.slane %v94_v22, 1  ;;  %v864_v40 = vadd.s32 8, %v849_v23  ;;  %v75_v45 = vmax.f32 %v73_v53, %v74_v24 }
  0x20   :  { %v102_v46 = vrot.slane %v101_v25, 1  ;;  %v113_v51 = vmax.f32 %v111_v55, %v112_v26  ;;  %v126_v52 = vrot.slane %v125_v27, 4  ;;  %v82_v54 = vmax.f32 %v80_v58, %v81_v28 }
  0x21   :  { %v109_v59 = vrot.slane %v108_v29, 1  ;;  %v133_v14 = vrot.slane %v132_v30, 4  ;;  %v153_v17 = vmax.f32 %v855_v31, %v857_v32  ;;  %v872_v49 = vmax.f32 %v87_v63, %v88_v33 }
  0x22   :  { %v120_v50 = vmax.f32 %v118_v10, %v119_v34  ;;  %v140_v20 = vrot.slane %v139_v35, 4  ;;  %v147_v21 = vrot.slane %v146_v36, 4  ;;  %v874_v11 = vmax.f32 %v94_v22, %v95_v39 }
  0x23   :  { %v160_v62 = vmax.f32 %v866_v41, %v868_v44  ;;  %v167_v53 = vsub.f32 %v773_v0, %v61_v37  ;;  %v168_v55 = vsub.f32 %v775_v1, %v68_v38  ;;  %v880_v58 = vmax.f32 %v101_v25, %v102_v46 }
  0x24   :  { %v114_v24 = vrot.slane %v113_v51, 2  ;;  %v127_v26 = vmax.f32 %v125_v27, %v126_v52  ;;  %v169_v28 = vsub.f32 %v777_v2, %v61_v37  ;;  %v883_v63 = vmax.f32 %v108_v29, %v109_v59 }
  0x25   :  { %v134_v10 = vmax.f32 %v132_v30, %v133_v14  ;;  %v154_v33 = vrot.slane %v153_v17, 4  ;;  %v170_v22 = vsub.f32 %v779_v3, %v68_v38  ;;  %v121_v34 = vrot.slane %v120_v50, 2 }
  0x26   :  { %v141_v39 = vmax.f32 %v139_v35, %v140_v20  ;;  %v148_v32 = vmax.f32 %v146_v36, %v147_v21  ;;  %v171_v44 = vsub.f32 %v781_v4, %v75_v45  ;;  %v161_v0 = vrot.slane %v160_v62, 4 }
  0x27   :  { %v172_v1 = vsub.f32 %v785_v6, %v82_v54  ;;  %v199_v25 = vmul.f32 1.442695, %v167_v53  ;;  %v201_v46 = vmul.f32 1.442695, %v168_v55  ;;  %v115_v41 = vmax.f32 %v113_v51, %v114_v24 }
  0x28   :  { %v128_v27 = vrot.slane %v127_v26, 2  ;;  %v173_v2 = vsub.f32 %v783_v5, %v75_v45  ;;  %v203_v29 = vmul.f32 1.442695, %v169_v28  ;;  %v135_v37 = vrot.slane %v134_v10, 2 }
  0x29   :  { %v155_v14 = vmax.f32 %v153_v17, %v154_v33  ;;  %v174_v30 = vsub.f32 %v787_v7, %v82_v54  ;;  %v205_v3 = vmul.f32 1.442695, %v170_v22  ;;  %v122_v38 = vmax.f32 %v120_v50, %v121_v34 }
  0x2a   :  { %v142_v35 = vrot.slane %v141_v39, 2  ;;  %616 = vpow2.f32 %v199_v25  ;;  %v207_v36 = vmul.f32 1.442695, %v171_v44  ;;  %v149_v4 = vrot.slane %v148_v32, 2 }
  0x2b   :  { %v162_v52 = vmax.f32 %v160_v62, %v161_v0  ;;  %618 = vpow2.f32 %v201_v46  ;;  %v209_v6 = vmul.f32 1.442695, %v172_v1  ;;  %v116_v59 = vrot.slane %v115_v41, 1 }
  0x2c   :  { %v175_v51 = vsub.f32 %v789_v8, %v872_v49  ;;  %620 = vpow2.f32 %v203_v29  ;;  %v211_v5 = vmul.f32 1.442695, %v173_v2  ;;  %v129_v45 = vmax.f32 %v127_v26, %v128_v27 }
  0x2d   :  { %v176_v17 = vsub.f32 %v797_v12, %v874_v11  ;;  %622 = vpow2.f32 %v205_v3  ;;  %v213_v7 = vmul.f32 1.442695, %v174_v30  ;;  %v136_v54 = vmax.f32 %v134_v10, %v135_v37 }
  0x2e   :  { %v156_v50 = vrot.slane %v155_v14, 2  ;;  %v177_v44 = vsub.f32 %v791_v9, %v872_v49  ;;  %624 = vpow2.f32 %v207_v36  ;;  %v123_v62 = vrot.slane %v122_v38, 1 }
  0x2f   :  { %v163_v20 = vrot.slane %v162_v52, 2  ;;  %v178_v21 = vsub.f32 %v799_v13, %v874_v11  ;;  %626 = vpow2.f32 %v209_v6  ;;  %v143_v8 = vmax.f32 %v141_v39, %v142_v35 }
  0x30   :  { %v179_v53 = vsub.f32 %v803_v15, %v880_v58  ;;  %628 = vpow2.f32 %v211_v5  ;;  %v215_v12 = vmul.f32 1.442695, %v175_v51  ;;  %v150_v55 = vmax.f32 %v148_v32, %v149_v4 }
  0x31   :  { %v180_v24 = vsub.f32 %v809_v18, %v883_v63  ;;  %630 = vpow2.f32 %v213_v7  ;;  %v217_v26 = vmul.f32 1.442695, %v176_v17  ;;  %v130_v9 = vrot.slane %v129_v45, 1  ;;  %v1213_v17 = vld [vmem:[#allocation8_spill] sm:$0xff] }
  0x32   :  { %v157_v49 = vmax.f32 %v155_v14, %v156_v50  ;;  %v181_v28 = vsub.f32 %v805_v16, %v880_v58  ;;  %v219_v10 = vmul.f32 1.442695, %v177_v44  ;;  %v137_v13 = vrot.slane %v136_v54, 1 }
  0x33   :  { %v164_v11 = vmax.f32 %v162_v52, %v163_v20  ;;  %v182_v33 = vsub.f32 %v811_v19, %v883_v63  ;;  %v221_v15 = vmul.f32 1.442695, %v178_v21  ;;  %v117_v22 = vmax.f32 %v115_v41, %v116_v59 }
  0x34   :  { %v124_v34 = vmax.f32 %v122_v38, %v123_v62  ;;  %632 = vpow2.f32 %v215_v12  ;;  %v223_v32 = vmul.f32 1.442695, %v179_v53  ;;  %v144_v39 = vrot.slane %v143_v8, 1  ;;  %v1215_v53 = vld [vmem:[#allocation10_spill] sm:$0xff] }
  0x35   :  { %v151_v18 = vrot.slane %v150_v55, 1  ;;  %634 = vpow2.f32 %v217_v26  ;;  %v225_v0 = vmul.f32 1.442695, %v180_v24  ;;  %v906_v1 = vmax.f32 %v129_v45, %v130_v9  ;;  %v1216_v9 = vld [vmem:[#allocation11_spill] sm:$0xff] }
  0x36   :  { %v158_v25 = vrot.slane %v157_v49, 1  ;;  %636 = vpow2.f32 %v219_v10  ;;  %v227_v16 = vmul.f32 1.442695, %v181_v28  ;;  %v910_v46 = vmax.f32 %v136_v54, %v137_v13  ;;  %v1214_v54 = vld [vmem:[#allocation9_spill] sm:$0xff] }
  0x37   :  { %v908_v58 = vpop.eup %616  ;;  %v165_v27 = vrot.slane %v164_v11, 1  ;;  %638 = vpow2.f32 %v221_v15  ;;  %v229_v19 = vmul.f32 1.442695, %v182_v33  ;;  %v183_v63 = vsub.f32 %v821_v42, %v117_v22  ;;  %v1217_v33 = vld [vmem:[#allocation13_spill] sm:$0xff] }
  0x38   :  { %v912_v41 = vpop.eup %618  ;;  %640 = vpow2.f32 %v223_v32  ;;  %v916_v2 = vcvt.s32.f32 %v849_v23  ;;  %v919_v29 = vcvt.s32.f32 %v864_v40  ;;  %v923_v14 = vmax.f32 %v143_v8, %v144_v39 }
  0x39   :  { %v921_v37 = vpop.eup %620  ;;  %v925_v30 = vmax.f32 %v150_v55, %v151_v18  ;;  %v184_v3 = vsub.f32 %v825_v47, %v124_v34  ;;  %642 = vpow2.f32 %v225_v0  ;;  %v930_v35 = vmax.f32 %v157_v49, %v158_v25  ;;  %v1219_v25 = vld [vmem:[#allocation14_spill] sm:$0xff] }
  0x3a   :  { %v928_v38 = vpop.eup %622  ;;  %v185_v42 = vsub.f32 %v823_v43, %v117_v22  ;;  %v186_v23 = vsub.f32 %v827_v48, %v124_v34  ;;  %644 = vpow2.f32 %v227_v16  ;;  %v936_v36 = vmax.f32 %v164_v11, %v165_v27  ;;  %v1218_v22 = vld [vmem:[#allocation12_spill] sm:$0xff] }
  0x3b   :  { %v934_v40 = vpop.eup %624  ;;  %v187_v4 = vsub.f32 %v831_v56, %v906_v1  ;;  %v188_v47 = vsub.f32 %v835_v60, %v910_v46  ;;  %646 = vpow2.f32 %v229_v19  ;;  %v189_v6 = vsub.f32 %v833_v57, %v906_v1 }
  0x3c   :  { %v942_v52 = vpop.eup %626  ;;  %v231_v43 = vmul.f32 1.442695, %v183_v63  ;;  %v268_v48 = vmul.f32 %v908_v58, %v916_v2  ;;  %v270_v59 = vmul.f32 %v921_v37, %v919_v29  ;;  %v190_v56 = vsub.f32 %v837_v61, %v910_v46 }
  0x3d   :  { %v950_v51 = vpop.eup %628  ;;  %v233_v5 = vmul.f32 1.442695, %v184_v3  ;;  %v269_v60 = vmul.f32 %v912_v41, %v916_v2  ;;  %v271_v45 = vmul.f32 %v928_v38, %v919_v29  ;;  %v191_v7 = vsub.f32 %v1213_v17, %v923_v14 }
  0x3e   :  { %v958_v57 = vpop.eup %630  ;;  %v192_v50 = vsub.f32 %v1214_v54, %v925_v30  ;;  %v235_v44 = vmul.f32 1.442695, %v185_v42  ;;  %v237_v62 = vmul.f32 1.442695, %v186_v23  ;;  %v272_v61 = vmul.f32 %v934_v40, %v916_v2 }
  0x3f   :  { %v273_v20 = vmul.f32 %v942_v52, %v916_v2  ;;  %v274_v21 = vmul.f32 %v950_v51, %v919_v29  ;;  %v275_v8 = vmul.f32 %v958_v57, %v919_v29  ;;  %v193_v12 = vsub.f32 %v1215_v53, %v923_v14 }
  0x40   :  { %648 = vpow2.f32 %v231_v43  ;;  %v239_v55 = vmul.f32 1.442695, %v187_v4  ;;  %v300_v24 = vadd.f32 %v270_v59, %v268_v48  ;;  %v194_v49 = vsub.f32 %v1216_v9, %v925_v30 }
  0x41   :  { %v974_v26 = vpop.eup %632  ;;  %650 = vpow2.f32 %v233_v5  ;;  %v241_v28 = vmul.f32 1.442695, %v188_v47  ;;  %v307_v10 = vadd.f32 %v271_v45, %v269_v60  ;;  %v195_v11 = vsub.f32 %v855_v31, %v930_v35 }
  0x42   :  { %v978_v13 = vpop.eup %634  ;;  %v196_v15 = vsub.f32 %v1217_v33, %v936_v36  ;;  %v197_v34 = vsub.f32 %v1218_v22, %v930_v35  ;;  %652 = vpow2.f32 %v235_v44  ;;  %v243_v39 = vmul.f32 1.442695, %v189_v6 }
  0x43   :  { %v986_v32 = vpop.eup %636  ;;  %654 = vpow2.f32 %v237_v62  ;;  %v314_v18 = vadd.f32 %v274_v21, %v272_v61  ;;  %v321_v0 = vadd.f32 %v275_v8, %v273_v20  ;;  %v198_v16 = vsub.f32 %v1219_v25, %v936_v36 }
  0x44   :  { %v988_v1 = vpop.eup %638  ;;  %656 = vpow2.f32 %v239_v55  ;;  %v245_v31 = vmul.f32 1.442695, %v190_v56  ;;  %v301_v46 = vrot.slane %v300_v24, 4  ;;  %v247_v19 = vmul.f32 1.442695, %v191_v7 }
  0x45   :  { %v992_v27 = vpop.eup %640  ;;  %658 = vpow2.f32 %v241_v28  ;;  %v249_v63 = vmul.f32 1.442695, %v192_v50  ;;  %v308_v14 = vrot.slane %v307_v10, 4  ;;  %v276_v3 = vmul.f32 %v974_v26, %v916_v2 }
  0x46   :  { %v994_v30 = vpop.eup %642  ;;  %v277_v35 = vmul.f32 %v978_v13, %v916_v2  ;;  %v278_v42 = vmul.f32 %v986_v32, %v919_v29  ;;  %v279_v23 = vmul.f32 %v988_v1, %v919_v29  ;;  %660 = vpow2.f32 %v243_v39 }
  0x47   :  { %v1004_v36 = vpop.eup %644  ;;  %v251_v4 = vmul.f32 1.442695, %v193_v12  ;;  %v315_v47 = vrot.slane %v314_v18, 4  ;;  %v322_v6 = vrot.slane %v321_v0, 4  ;;  %662 = vpow2.f32 %v245_v31 }
  0x48   :  { %v1006_v43 = vpop.eup %646  ;;  %v253_v48 = vmul.f32 1.442695, %v194_v49  ;;  %v255_v59 = vmul.f32 1.442695, %v195_v11  ;;  %v302_v56 = vadd.f32 %v301_v46, %v300_v24  ;;  %v280_v5 = vmul.f32 %v992_v27, %v916_v2 }
  0x49   :  { %v281_v60 = vmul.f32 %v994_v30, %v916_v2  ;;  %v282_v45 = vmul.f32 %v1004_v36, %v919_v29  ;;  %v283_v17 = vmul.f32 %v1006_v43, %v919_v29  ;;  %664 = vpow2.f32 %v247_v19 }
  0x4a   :  { %v309_v7 = vadd.f32 %v308_v14, %v307_v10  ;;  %v328_v54 = vadd.f32 %v278_v42, %v276_v3  ;;  %v335_v50 = vadd.f32 %v279_v23, %v277_v35  ;;  %666 = vpow2.f32 %v249_v63 }
  0x4b   :  { %v257_v44 = vmul.f32 1.442695, %v196_v15  ;;  %v316_v62 = vadd.f32 %v315_v47, %v314_v18  ;;  %v323_v61 = vadd.f32 %v322_v6, %v321_v0  ;;  %668 = vpow2.f32 %v251_v4 }
  0x4c   :  { %v259_v20 = vmul.f32 1.442695, %v197_v34  ;;  %v261_v21 = vmul.f32 1.442695, %v198_v16  ;;  %v303_v8 = vrot.slane %v302_v56, 2  ;;  %670 = vpow2.f32 %v253_v48 }
  0x4d   :  { %v1016_v53 = vpop.eup %648  ;;  %v342_v12 = vadd.f32 %v282_v45, %v280_v5  ;;  %v349_v55 = vadd.f32 %v283_v17, %v281_v60  ;;  %v412_v24 = vadd.f32 %v921_v37, %v908_v58  ;;  %672 = vpow2.f32 %v255_v59 }
  0x4e   :  { %v1020_v9 = vpop.eup %650  ;;  %v310_v49 = vrot.slane %v309_v7, 2  ;;  %v329_v28 = vrot.slane %v328_v54, 4  ;;  %v336_v10 = vrot.slane %v335_v50, 4  ;;  %674 = vpow2.f32 %v257_v44 }
  0x4f   :  { %v1022_v11 = vpop.eup %652  ;;  %v317_v33 = vrot.slane %v316_v62, 2  ;;  %v324_v15 = vrot.slane %v323_v61, 2  ;;  %v419_v22 = vadd.f32 %v928_v38, %v912_v41  ;;  %676 = vpow2.f32 %v259_v20 }
  0x50   :  { %v1026_v34 = vpop.eup %654  ;;  %v284_v58 = vmul.f32 %v1016_v53, %v916_v2  ;;  %v285_v37 = vmul.f32 %v1020_v9, %v916_v2  ;;  %v304_v39 = vadd.f32 %v303_v8, %v302_v56  ;;  %v286_v0 = vmul.f32 %v1022_v11, %v919_v29 }
  0x51   :  { %v1032_v18 = vpop.eup %656  ;;  %v287_v25 = vmul.f32 %v1026_v34, %v919_v29  ;;  %v343_v16 = vrot.slane %v342_v12, 4  ;;  %v350_v41 = vrot.slane %v349_v55, 4  ;;  %678 = vpow2.f32 %v261_v21 }
  0x52   :  { %v1038_v38 = vpop.eup %658  ;;  %v311_v31 = vadd.f32 %v310_v49, %v309_v7  ;;  %v330_v46 = vadd.f32 %v329_v28, %v328_v54  ;;  %v337_v19 = vadd.f32 %v336_v10, %v335_v50  ;;  %v318_v63 = vadd.f32 %v317_v33, %v316_v62 }
  0x53   :  { %v325_v14 = vadd.f32 %v324_v15, %v323_v61  ;;  %v1040_v3 = vpop.eup %660  ;;  %v413_v35 = vrot.slane %v412_v24, 4  ;;  %v420_v42 = vrot.slane %v419_v22, 4  ;;  %v344_v4 = vadd.f32 %v343_v16, %v342_v12 }
  0x54   :  { %v1042_v23 = vpop.eup %662  ;;  %v351_v47 = vadd.f32 %v350_v41, %v349_v55  ;;  %v356_v6 = vadd.f32 %v286_v0, %v284_v58  ;;  %v363_v48 = vadd.f32 %v287_v25, %v285_v37  ;;  %v305_v59 = vrot.slane %v304_v39, 1 }
  0x55   :  { %v312_v56 = vrot.slane %v311_v31, 1  ;;  %v331_v5 = vrot.slane %v330_v46, 2  ;;  %v338_v60 = vrot.slane %v337_v19, 2  ;;  %v319_v17 = vrot.slane %v318_v63, 1 }
  0x56   :  { %v1044_v45 = vpop.eup %664  ;;  %v326_v7 = vrot.slane %v325_v14, 1  ;;  %v414_v50 = vadd.f32 %v413_v35, %v412_v24  ;;  %v421_v44 = vadd.f32 %v420_v42, %v419_v22  ;;  %v345_v61 = vrot.slane %v344_v4, 2 }
  0x57   :  { %v1046_v54 = vpop.eup %666  ;;  %v352_v20 = vrot.slane %v351_v47, 2  ;;  %v357_v21 = vrot.slane %v356_v6, 4  ;;  %v364_v8 = vrot.slane %v363_v48, 4  ;;  %v1052_v55 = vadd.f32 %v305_v59, %v304_v39 }
  0x58   :  { %v1048_v62 = vpop.eup %668  ;;  %v1054_v49 = vadd.f32 %v312_v56, %v311_v31  ;;  %v332_v28 = vadd.f32 %v331_v5, %v330_v46  ;;  %v339_v10 = vadd.f32 %v338_v60, %v337_v19  ;;  %v288_v24 = vmul.f32 %v1032_v18, %v916_v2 }
  0x59   :  { %v1050_v12 = vpop.eup %670  ;;  %1220 = vst [vmem:[#allocation8_spill] sm:$0xff] %v1052_v55  ;;  %v289_v15 = vmul.f32 %v1038_v38, %v916_v2  ;;  %v1062_v22 = vadd.f32 %v319_v17, %v318_v63  ;;  %v1064_v58 = vadd.f32 %v326_v7, %v325_v14  ;;  %v290_v39 = vmul.f32 %v1040_v3, %v919_v29 }
  0x5a   :  { %1221 = vst [vmem:[#allocation9_spill] sm:$0xff] %v1054_v49  ;;  %v1056_v33 = vpop.eup %672  ;;  %v291_v0 = vmul.f32 %v1042_v23, %v919_v29  ;;  %v415_v25 = vrot.slane %v414_v50, 2  ;;  %v422_v16 = vrot.slane %v421_v44, 2  ;;  %v1074_v31 = vadd.f32 %v345_v61, %v344_v4 }
  0x5b   :  { %1222 = vst [vmem:[#allocation10_spill] sm:$0xff] %v1062_v22  ;;  %1223 = vst [vmem:[#allocation11_spill] sm:$0xff] %v1064_v58  ;;  %v1066_v37 = vpop.eup %674  ;;  %v1076_v46 = vadd.f32 %v352_v20, %v351_v47  ;;  %v1078_v19 = vadd.f32 %v357_v21, %v356_v6  ;;  %v1080_v63 = vadd.f32 %v364_v8, %v363_v48  ;;  %v333_v42 = vrot.slane %v332_v28, 1 }
  0x5c   :  { %v1072_v41 = vpop.eup %676  ;;  %v292_v14 = vmul.f32 %v1044_v45, %v916_v2  ;;  %v293_v35 = vmul.f32 %v1046_v54, %v916_v2  ;;  %v340_v59 = vrot.slane %v339_v10, 1  ;;  %v294_v4 = vmul.f32 %v1048_v62, %v919_v29 }
  0x5d   :  { %v295_v47 = vmul.f32 %v1050_v12, %v919_v29  ;;  %v296_v6 = vmul.f32 %v1056_v33, %v916_v2  ;;  %v298_v48 = vmul.f32 %v1072_v41, %v919_v29  ;;  %v297_v5 = vmul.f32 %v1066_v37, %v916_v2 }
  0x5e   :  { %v1086_v56 = vpop.eup %678  ;;  %v416_v17 = vadd.f32 %v415_v25, %v414_v50  ;;  %v423_v7 = vadd.f32 %v422_v16, %v421_v44  ;;  %v359_v21 = vrot.slane %v1078_v19, 2  ;;  %v366_v8 = vrot.slane %v1080_v63, 2 }
  0x5f   :  { %v299_v60 = vmul.f32 %v1086_v56, %v919_v29  ;;  %v1104_v58 = vadd.f32 %v333_v42, %v332_v28  ;;  %v1106_v49 = vadd.f32 %v340_v59, %v339_v10  ;;  %v1108_v22 = vadd.f32 %v290_v39, %v288_v24 }
  0x60   :  { %v1110_v2 = vadd.f32 %v291_v0, %v289_v15  ;;  %v1112_v55 = vadd.f32 %v294_v4, %v292_v14  ;;  %v1114_v29 = vadd.f32 %v295_v47, %v293_v35  ;;  %v1116_v50 = vadd.f32 %v298_v48, %v296_v6 }
  0x61   :  { %v426_v44 = vadd.f32 %v950_v51, %v934_v40  ;;  %v1120_v25 = vadd.f32 %v299_v60, %v297_v5  ;;  %v417_v16 = vrot.slane %v416_v17, 1  ;;  %v424_v28 = vrot.slane %v423_v7, 1 }
  0x62   :  { %v433_v10 = vadd.f32 %v958_v57, %v942_v52  ;;  %v440_v15 = vadd.f32 %v986_v32, %v974_v26  ;;  %v447_v39 = vadd.f32 %v988_v1, %v978_v13  ;;  %v454_v0 = vadd.f32 %v1004_v36, %v992_v27 }
  0x63   :  { %v427_v24 = vrot.slane %v426_v44, 4  ;;  %v461_v40 = vadd.f32 %v1006_v43, %v994_v30  ;;  %v468_v51 = vadd.f32 %v1022_v11, %v1016_v53  ;;  %v475_v52 = vadd.f32 %v1026_v34, %v1020_v9 }
  0x64   :  { %v434_v14 = vrot.slane %v433_v10, 4  ;;  %v441_v35 = vrot.slane %v440_v15, 4  ;;  %v448_v42 = vrot.slane %v447_v39, 4  ;;  %v455_v26 = vrot.slane %v454_v0, 4 }
  0x65   :  { %v428_v57 = vadd.f32 %v427_v24, %v426_v44  ;;  %v462_v59 = vrot.slane %v461_v40, 4  ;;  %v469_v13 = vrot.slane %v468_v51, 4  ;;  %v476_v1 = vrot.slane %v475_v52, 4 }
  0x66   :  { %v435_v32 = vadd.f32 %v434_v14, %v433_v10  ;;  %v442_v27 = vadd.f32 %v441_v35, %v440_v15  ;;  %v449_v36 = vadd.f32 %v448_v42, %v447_v39  ;;  %v456_v47 = vadd.f32 %v455_v26, %v454_v0 }
  0x67   :  { %v429_v4 = vrot.slane %v428_v57, 2  ;;  %v463_v30 = vadd.f32 %v462_v59, %v461_v40  ;;  %v470_v43 = vadd.f32 %v469_v13, %v468_v51  ;;  %v477_v48 = vadd.f32 %v476_v1, %v475_v52 }
  0x68   :  { %v436_v6 = vrot.slane %v435_v32, 2  ;;  %v443_v11 = vrot.slane %v442_v27, 2  ;;  %v450_v5 = vrot.slane %v449_v36, 2  ;;  %v457_v9 = vrot.slane %v456_v47, 2 }
  0x69   :  { %v430_v53 = vadd.f32 %v429_v4, %v428_v57  ;;  %v464_v60 = vrot.slane %v463_v30, 2  ;;  %v471_v44 = vrot.slane %v470_v43, 2  ;;  %v478_v24 = vrot.slane %v477_v48, 2 }
  0x6a   :  { %v437_v34 = vadd.f32 %v436_v6, %v435_v32  ;;  %v444_v14 = vadd.f32 %v443_v11, %v442_v27  ;;  %v451_v20 = vadd.f32 %v450_v5, %v449_v36  ;;  %v458_v61 = vadd.f32 %v457_v9, %v456_v47 }
  0x6b   :  { %v431_v10 = vrot.slane %v430_v53, 1  ;;  %v371_v15 = vrot.slane %v1108_v22, 4  ;;  %v465_v0 = vadd.f32 %v464_v60, %v463_v30  ;;  %v472_v35 = vadd.f32 %v471_v44, %v470_v43 }
  0x6c   :  { %v438_v39 = vrot.slane %v437_v34, 1  ;;  %v378_v40 = vrot.slane %v1110_v2, 4  ;;  %v385_v51 = vrot.slane %v1112_v55, 4  ;;  %v392_v52 = vrot.slane %v1114_v29, 4 }
  0x6d   :  { %v399_v57 = vrot.slane %v1116_v50, 4  ;;  %v418_v42 = vadd.f32 %v417_v16, %v416_v17  ;;  %v425_v26 = vadd.f32 %v424_v28, %v423_v7  ;;  %v432_v32 = vadd.f32 %v431_v10, %v430_v53 }
  0x6e   :  { %v479_v59 = vadd.f32 %v478_v24, %v477_v48  ;;  %v445_v13 = vrot.slane %v444_v14, 1  ;;  %v452_v1 = vrot.slane %v451_v20, 1  ;;  %v459_v4 = vrot.slane %v458_v61, 1 }
  0x6f   :  { %v482_v27 = vadd.f32 %v1040_v3, %v1032_v18  ;;  %v439_v36 = vadd.f32 %v438_v39, %v437_v34  ;;  %v466_v47 = vrot.slane %v465_v0, 1  ;;  %v473_v6 = vrot.slane %v472_v35, 1 }
  0x70   :  { %v489_v30 = vadd.f32 %v1042_v23, %v1038_v38  ;;  %v496_v11 = vadd.f32 %v1048_v62, %v1044_v45  ;;  %v503_v17 = vadd.f32 %v1050_v12, %v1046_v54  ;;  %v510_v7 = vadd.f32 %v1072_v41, %v1056_v33 }
  0x71   :  { %v483_v43 = vrot.slane %v482_v27, 4  ;;  %v480_v16 = vrot.slane %v479_v59, 1  ;;  %v517_v18 = vadd.f32 %v1086_v56, %v1066_v37  ;;  %680 = vrcp.f32 %v418_v42 }
  0x72   :  { %v490_v28 = vrot.slane %v489_v30, 4  ;;  %v497_v48 = vrot.slane %v496_v11, 4  ;;  %v504_v53 = vrot.slane %v503_v17, 4  ;;  %v511_v38 = vrot.slane %v510_v7, 4 }
  0x73   :  { %v484_v3 = vadd.f32 %v483_v43, %v482_v27  ;;  %v446_v23 = vadd.f32 %v445_v13, %v444_v14  ;;  %v518_v9 = vrot.slane %v517_v18, 4  ;;  %682 = vrcp.f32 %v425_v26 }
  0x74   :  { %v491_v5 = vadd.f32 %v490_v28, %v489_v30  ;;  %v498_v62 = vadd.f32 %v497_v48, %v496_v11  ;;  %v505_v54 = vadd.f32 %v504_v53, %v503_v17  ;;  %v512_v12 = vadd.f32 %v511_v38, %v510_v7  ;;  %v1224_v53 = vld [vmem:[#allocation8_spill] sm:$0xff] }
  0x75   :  { %v485_v45 = vrot.slane %v484_v3, 2  ;;  %v453_v34 = vadd.f32 %v452_v1, %v451_v20  ;;  %v519_v41 = vadd.f32 %v518_v9, %v517_v18  ;;  %684 = vrcp.f32 %v432_v32 }
  0x76   :  { %v492_v33 = vrot.slane %v491_v5, 2  ;;  %v499_v44 = vrot.slane %v498_v62, 2  ;;  %v506_v37 = vrot.slane %v505_v54, 2  ;;  %v513_v56 = vrot.slane %v512_v12, 2 }
  0x77   :  { %v486_v60 = vadd.f32 %v485_v45, %v484_v3  ;;  %v460_v24 = vadd.f32 %v459_v4, %v458_v61  ;;  %v520_v39 = vrot.slane %v519_v41, 2  ;;  %686 = vrcp.f32 %v439_v36 }
  0x78   :  { %v493_v10 = vadd.f32 %v492_v33, %v491_v5  ;;  %v500_v42 = vadd.f32 %v499_v44, %v498_v62  ;;  %v507_v13 = vadd.f32 %v506_v37, %v505_v54  ;;  %v514_v26 = vadd.f32 %v513_v56, %v512_v12  ;;  %v1226_v54 = vld [vmem:[#allocation9_spill] sm:$0xff] }
  0x79   :  { %v487_v14 = vrot.slane %v486_v60, 1  ;;  %v467_v27 = vadd.f32 %v466_v47, %v465_v0  ;;  %v521_v43 = vadd.f32 %v520_v39, %v519_v41  ;;  %688 = vrcp.f32 %v446_v23 }
  0x7a   :  { %v494_v30 = vrot.slane %v493_v10, 1  ;;  %v372_v20 = vadd.f32 %v371_v15, %v1108_v22  ;;  %v406_v32 = vrot.slane %v1120_v25, 4  ;;  %v474_v1 = vadd.f32 %v473_v6, %v472_v35 }
  0x7b   :  { %v501_v11 = vrot.slane %v500_v42, 1  ;;  %v379_v17 = vadd.f32 %v378_v40, %v1110_v2  ;;  %v481_v61 = vadd.f32 %v480_v16, %v479_v59  ;;  %v508_v4 = vrot.slane %v507_v13, 1 }
  0x7c   :  { %690 = vrcp.f32 %v453_v34  ;;  %v386_v36 = vadd.f32 %v385_v51, %v1112_v55  ;;  %v488_v0 = vadd.f32 %v487_v14, %v486_v60  ;;  %v515_v47 = vrot.slane %v514_v26, 1  ;;  %v1227_v34 = vld [vmem:[#allocation11_spill] sm:$0xff] }
  0x7d   :  { %692 = vrcp.f32 %v460_v24  ;;  %v393_v22 = vadd.f32 %v392_v52, %v1114_v29  ;;  %v495_v15 = vadd.f32 %v494_v30, %v493_v10  ;;  %v522_v35 = vrot.slane %v521_v43, 1 }
  0x7e   :  { %694 = vrcp.f32 %v467_v27  ;;  %v681_v6 = vpop.eup %680  ;;  %v373_v2 = vrot.slane %v372_v20, 2  ;;  %v400_v40 = vadd.f32 %v399_v57, %v1116_v50  ;;  %v502_v59 = vadd.f32 %v501_v11, %v500_v42 }
  0x7f   :  { %696 = vrcp.f32 %v474_v1  ;;  %v380_v55 = vrot.slane %v379_v17, 2  ;;  %v407_v51 = vadd.f32 %v406_v32, %v1120_v25  ;;  %v509_v7 = vadd.f32 %v508_v4, %v507_v13 }
  0x80   :  { %698 = vrcp.f32 %v481_v61  ;;  %v683_v16 = vpop.eup %682  ;;  %v360_v29 = vadd.f32 %v359_v21, %v1078_v19  ;;  %v387_v52 = vrot.slane %v386_v36, 2  ;;  %v516_v28 = vadd.f32 %v515_v47, %v514_v26  ;;  %v1225_v19 = vld [vmem:[#allocation10_spill] sm:$0xff] }
  0x81   :  { %700 = vrcp.f32 %v488_v0  ;;  %v367_v50 = vadd.f32 %v366_v8, %v1080_v63  ;;  %v394_v57 = vrot.slane %v393_v22, 2  ;;  %v523_v18 = vadd.f32 %v522_v35, %v521_v43 }
  0x82   :  { %702 = vrcp.f32 %v495_v15  ;;  %v685_v3 = vpop.eup %684  ;;  %v374_v48 = vadd.f32 %v373_v2, %v372_v20  ;;  %v401_v25 = vrot.slane %v400_v40, 2  ;;  %v540_v38 = vmul.f32 %v681_v6, %v1224_v53 }
  0x83   :  { %704 = vrcp.f32 %v502_v59  ;;  %v381_v23 = vadd.f32 %v380_v55, %v379_v17  ;;  %v408_v5 = vrot.slane %v407_v51, 2  ;;  %v542_v21 = vmul.f32 %v685_v3, %v1225_v19 }
  0x84   :  { %706 = vrcp.f32 %v509_v7  ;;  %v687_v9 = vpop.eup %686  ;;  %v361_v45 = vrot.slane %v360_v29, 1  ;;  %v388_v62 = vadd.f32 %v387_v52, %v386_v36  ;;  %v541_v63 = vmul.f32 %v683_v16, %v1226_v54 }
  0x85   :  { %708 = vrcp.f32 %v516_v28  ;;  %v368_v8 = vrot.slane %v367_v50, 1  ;;  %v395_v12 = vadd.f32 %v394_v57, %v393_v22  ;;  %v543_v33 = vmul.f32 %v687_v9, %v1227_v34 }
  0x86   :  { %710 = vrcp.f32 %v523_v18  ;;  %v689_v41 = vpop.eup %688  ;;  %v1228_v60 = vrot.slane %v1074_v31, 1  ;;  %v375_v37 = vrot.slane %v374_v48, 1  ;;  %v402_v56 = vadd.f32 %v401_v25, %v400_v40 }
  0x87   :  { %v573_v24 = vsel %vm572_vm0, %v542_v21, %v540_v38  ;;  %v1229_v10 = vrot.slane %v1076_v46, 1  ;;  %v382_v14 = vrot.slane %v381_v23, 1  ;;  %v409_v42 = vadd.f32 %v408_v5, %v407_v51 }
  0x88   :  { %v348_v44 = vadd.f32 %v1228_v60, %v1074_v31  ;;  %v544_v13 = vmul.f32 %v689_v41, %v1104_v58  ;;  %v362_v27 = vadd.f32 %v361_v45, %v360_v29  ;;  %v389_v30 = vrot.slane %v388_v62, 1 }
  0x89   :  { %v355_v39 = vadd.f32 %v1229_v10, %v1076_v46  ;;  %v691_v26 = vpop.eup %690  ;;  %v586_v43 = vsel %vm572_vm0, %v543_v33, %v541_v63  ;;  %v369_v31 = vadd.f32 %v368_v8, %v367_v50  ;;  %v396_v32 = vrot.slane %v395_v12, 1 }
  0x8a   :  { %v693_v20 = vpop.eup %692  ;;  %v545_v1 = vmul.f32 %v691_v26, %v1106_v49  ;;  %v575_v11 = vsel %vm574_vm1, %v544_v13, %v573_v24  ;;  %v376_v61 = vadd.f32 %v375_v37, %v374_v48  ;;  %v403_v46 = vrot.slane %v402_v56, 1 }
  0x8b   :  { %v695_v17 = vpop.eup %694  ;;  %v546_v4 = vmul.f32 %v693_v20, %v348_v44  ;;  %v383_v58 = vadd.f32 %v382_v14, %v381_v23  ;;  %v410_v0 = vrot.slane %v409_v42, 1  ;;  %v390_v35 = vadd.f32 %v389_v30, %v388_v62 }
  0x8c   :  { %v697_v36 = vpop.eup %696  ;;  %v547_v47 = vmul.f32 %v695_v17, %v355_v39  ;;  %v587_v22 = vsel %vm574_vm1, %v545_v1, %v586_v43  ;;  %v397_v49 = vadd.f32 %v396_v32, %v395_v12  ;;  %v404_v7 = vadd.f32 %v403_v46, %v402_v56 }
  0x8d   :  { %v699_v15 = vpop.eup %698  ;;  %v548_v6 = vmul.f32 %v697_v36, %v362_v27  ;;  %v577_v2 = vsel %vm576_vm2, %v546_v4, %v575_v11  ;;  %v411_v28 = vadd.f32 %v410_v0, %v409_v42 }
  0x8e   :  { %v701_v40 = vpop.eup %700  ;;  %v549_v59 = vmul.f32 %v699_v15, %v369_v31  ;;  %v588_v55 = vsel %vm576_vm2, %v547_v47, %v587_v22 }
  0x8f   :  { %v703_v51 = vpop.eup %702  ;;  %v550_v16 = vmul.f32 %v701_v40, %v376_v61  ;;  %v579_v29 = vsel %vm578_vm3, %v548_v6, %v577_v2 }
  0x90   :  { %v705_v52 = vpop.eup %704  ;;  %v551_v50 = vmul.f32 %v703_v51, %v383_v58  ;;  %v589_v57 = vsel %vm578_vm3, %v549_v59, %v588_v55 }
  0x91   :  { %v707_v18 = vpop.eup %706  ;;  %v552_v3 = vmul.f32 %v705_v52, %v390_v35  ;;  %v581_v48 = vsel %vm580_vm4, %v550_v16, %v579_v29 }
  0x92   :  { %v709_v25 = vpop.eup %708  ;;  %v553_v53 = vmul.f32 %v707_v18, %v397_v49  ;;  %v590_v38 = vsel %vm580_vm4, %v551_v50, %v589_v57 }
  0x93   :  { %v711_v23 = vpop.eup %710  ;;  %v554_v5 = vmul.f32 %v709_v25, %v404_v7  ;;  %v583_v19 = vsel %vm582_vm5, %v552_v3, %v581_v48 }
  0x94   :  { %v555_v21 = vmul.f32 %v711_v23, %v411_v28  ;;  %v591_v9 = vsel %vm582_vm5, %v553_v53, %v590_v38 }
  0x95   :  { %v585_v45 = vsel %vm584_vm6, %v554_v5, %v583_v19 }
  0x96   :  { %v592_v62 = vsel %vm584_vm6, %v555_v21, %v591_v9  ;;  %595 = vst [vmem:[#allocation5] sm:$0xff] %v585_v45 }
  0x97   :  { %596 = vst [vmem:[#allocation5 + $0x8] sm:$0xff] %v592_v62 }
  0x98   :  { %743 = shalt.err (!%p740_p9)
}
  0x99   :  { %606 = dma.vmem_to_hbm [thread:$0]  %s604_s13, 256, %s1198_s1, [#allocation4]  }
  0x9a   :  { %754 = dma.done.wait [#allocation4], 256  }
  0x9b   :  { %755 = vsyncadd [#allocation4], 4294967040 }
  0x9c   :  { %610 = vsyncpa [#allocation3], 1 }
  0x9d   :  { %611 = vsyncpa [#allocation4], 1 }

</bundles_post_ra>
